<compile_context>
chip_gen: v7x
topology: tpu7x:2x2x1
jax: 0.10.0
libtpu: 0.0.40
codegen_flags: <defaults>
</compile_context>

<pallas_src>
from functools import lru_cache

import numpy as np
import jax
import jax.numpy as jnp
from jax.experimental import pallas as pl
from jax.experimental.pallas import tpu as pltpu

_SUBLANES = 8          # sublanes per dense output tile
_MIN_LANES = 128       # minimum lane width (one full (8,128) vreg tile)
_MAX_TILE_LANES = 2048 # lanes per grid step (8*2048 f32 = 64 KiB/block)


def _grouped_gather_kernel(params_ref, idx_ref, out_ref):
    """out[s, l] = params[idx[s, l]].

    params_ref : (G,) float32 scalars in SMEM.
    idx_ref    : (8, TB) int32 dense VMEM tile (batch folded sublane x lane).
    out_ref    : (8, TB) float32 dense VMEM tile.

    G unrolled compare/selects on full (8, TB) vregs; no iota, no (G, TB)
    intermediate, no cross-sublane reduce.
    """
    idx = idx_ref[...]
    acc = jnp.zeros(idx.shape, jnp.float32)
    # TODO(synk): for large n_groups (>~64) replace the unrolled selects with a
    # scalar-prefetch / jnp.take-based gather.
    for g in range(params_ref.shape[0]):
        acc = jnp.where(idx == g, params_ref[g], acc)
    out_ref[...] = acc


def _bucket(b: int):
    """Pad batch to a power-of-two bucket that folds into dense (8, lanes) tiles."""
    bp = 1 << max(b - 1, 0).bit_length()            # next power of two >= b
    bp = max(bp, _SUBLANES * _MIN_LANES)             # at least one full (8,128) tile
    lanes = bp // _SUBLANES
    tile_lanes = min(_MAX_TILE_LANES, lanes)         # both powers of two -> divides
    return bp, lanes, tile_lanes


@lru_cache(maxsize=None)
def _build_gather(lanes: int, tile_lanes: int, b_valid: int):
    """Compile-cached jitted gather for one padded layout."""
    gather = pl.pallas_call(
        _grouped_gather_kernel,
        out_shape=jax.ShapeDtypeStruct((_SUBLANES, lanes), jnp.float32),
        grid=(lanes // tile_lanes,),
        in_specs=[
            # Whole (G,) parameter vector as SMEM scalars (no VMEM broadcast).
            pl.BlockSpec(memory_space=pltpu.MemorySpace.SMEM),
            # Dense (8, TB) index tiles along the lane axis.
            pl.BlockSpec((_SUBLANES, tile_lanes), lambda i: (0, i)),
        ],
        out_specs=pl.BlockSpec((_SUBLANES, tile_lanes), lambda i: (0, i)),
        compiler_params=pltpu.CompilerParams(
            dimension_semantics=("parallel",)),      # batch tiles shard across TCs
    )

    @jax.jit
    def run(params, idx2d):
        out = gather(params, idx2d)                  # (8, lanes) f32
        return out.reshape(-1)[:b_valid].reshape(b_valid, 1)

    return run


class GroupedParameterMappingJAX:
    """JAX/Pallas port of GroupedParameterMapping (forward pass only)."""

    def __init__(self, location_groups: dict, init_val: float = 0.0,
                 init_val_group: dict = None):
        assert init_val_group is None or all(
            g in init_val_group for g in set(location_groups.values()))
        groups = list(dict.fromkeys(location_groups.values()))  # stable order
        group_to_ix = {g: i for i, g in enumerate(groups)}
        self._loc_ixs = {loc: group_to_ix[g] for loc, g in location_groups.items()}
        self._n_groups = len(groups)
        if init_val_group is None:
            vals = [float(init_val)] * self._n_groups
        else:
            vals = [float(init_val_group[g]) for g in groups]
        # One scalar parameter per group, staged as a flat (G,) f32 vector that
        # the kernel consumes directly from SMEM.
        self._params = jnp.asarray(vals, dtype=jnp.float32)
        # Cache of device-resident, pre-padded (8, lanes) index tiles keyed by
        # the exact batch of locations (avoids per-call list build + H2D copy).
        self._idx_cache = {}

    @property
    def locations(self):
        return list(self._loc_ixs.keys())

    @property
    def location_group_ixs(self) -> dict:
        return dict(self._loc_ixs)

    def _staged_indices(self, locations):
        key = tuple(locations)
        cached = self._idx_cache.get(key)
        if cached is None:
            b = len(locations)
            bp, lanes, tile_lanes = _bucket(b)
            idx = np.zeros((bp,), dtype=np.int32)    # pad with valid index 0
            idx[:b] = [self._loc_ixs[loc] for loc in locations]
            idx2d = jnp.asarray(idx.reshape(_SUBLANES, lanes))
            cached = (idx2d, b, lanes, tile_lanes)
            self._idx_cache[key] = cached
        return cached

    def forward(self, xs: dict) -> jax.Array:
        locations = xs['location']
        if len(locations) == 0:
            return jnp.zeros((0, 1), jnp.float32)
        idx2d, b, lanes, tile_lanes = self._staged_indices(locations)
        run = _build_gather(lanes, tile_lanes, b)
        return run(self._params, idx2d)

    def __call__(self, xs: dict) -> jax.Array:
        return self.forward(xs)

    def get_parameters(self, xs: dict) -> jax.Array:
        return self(xs)


if __name__ == "__main__":
    key = jax.random.PRNGKey(0)

    # Static mapping: 8 locations assigned to 3 groups.
    location_groups = {
        "loc_a": "g0", "loc_b": "g1", "loc_c": "g2", "loc_d": "g0",
        "loc_e": "g1", "loc_f": "g2", "loc_g": "g0", "loc_h": "g1",
    }

    # Deterministic per-group init values.
    k_vals, k_batch = jax.random.split(key)
    group_vals = jax.random.normal(k_vals, (3,), dtype=jnp.float32)
    init_val_group = {"g0": float(group_vals[0]),
                      "g1": float(group_vals[1]),
                      "g2": float(group_vals[2])}

    model = GroupedParameterMappingJAX(location_groups,
                                       init_val_group=init_val_group)

    # Deterministic batch of locations (size 8).
    all_locs = model.locations
    batch_ix = jax.random.randint(k_batch, (8,), 0, len(all_locs))
    batch_locations = [all_locs[int(i)] for i in batch_ix]
    xs = {"location": batch_locations}

    out = model.get_parameters(xs)
    out = jax.block_until_ready(out)

    # Reference check in plain JAX.
    ref = jnp.stack(
        [model._params[model._loc_ixs[loc]] for loc in batch_locations]
    ).reshape(-1, 1)
    assert out.shape == (8, 1) and out.dtype == jnp.float32
    assert bool(jnp.allclose(out, ref)), "mismatch vs reference gather"

    # Second call with the same batch exercises the idx / compile caches.
    out2 = jax.block_until_ready(model.get_parameters(xs))
    assert bool(jnp.allclose(out2, ref)), "mismatch on cached path"

    print("KERNEL_OK")
</pallas_src>

<mosaic_0001>
module attributes {stable_mosaic.version = 11 : i64} {
  func.func @_grouped_gather_kernel(%arg0: i32, %arg1: memref<3xf32, #tpu.memory_space<smem>>, %arg2: memref<8x128xi32, #tpu.memory_space<vmem>>, %arg3: memref<8x128xf32, #tpu.memory_space<vmem>>) attributes {dimension_semantics = [#tpu.dimension_semantics<parallel>], iteration_bounds = array<i64: 1>, scalar_prefetch = 0 : i64, scratch_operands = 0 : i64, tpu.core_type = #tpu.core_type<tc>, window_params = [{transform_indices = @transform_0, window_bounds = array<i64: 3>}, {transform_indices = @transform_1, window_bounds = array<i64: 8, 128>}, {transform_indices = @transform_2, window_bounds = array<i64: 8, 128>}]} {
    %c0 = arith.constant 0 : index
    %c0_0 = arith.constant 0 : index
    %0 = vector.load %arg2[%c0, %c0_0] : memref<8x128xi32, #tpu.memory_space<vmem>>, vector<8x128xi32>
    %cst = arith.constant 0.000000e+00 : f32
    %1 = vector.broadcast %cst : f32 to vector<8x128xf32>
    %c0_i32 = arith.constant 0 : i32
    %2 = vector.broadcast %c0_i32 : i32 to vector<8x128xi32>
    %3 = arith.cmpi eq, %0, %2 : vector<8x128xi32>
    %c0_1 = arith.constant 0 : index
    %4 = memref.load %arg1[%c0_1] : memref<3xf32, #tpu.memory_space<smem>>
    %5 = vector.broadcast %4 : f32 to vector<8x128xf32>
    %6 = arith.select %3, %5, %1 : vector<8x128xi1>, vector<8x128xf32>
    %c1_i32 = arith.constant 1 : i32
    %7 = vector.broadcast %c1_i32 : i32 to vector<8x128xi32>
    %8 = arith.cmpi eq, %0, %7 : vector<8x128xi32>
    %c1 = arith.constant 1 : index
    %9 = memref.load %arg1[%c1] : memref<3xf32, #tpu.memory_space<smem>>
    %10 = vector.broadcast %9 : f32 to vector<8x128xf32>
    %11 = arith.select %8, %10, %6 : vector<8x128xi1>, vector<8x128xf32>
    %c2_i32 = arith.constant 2 : i32
    %12 = vector.broadcast %c2_i32 : i32 to vector<8x128xi32>
    %13 = arith.cmpi eq, %0, %12 : vector<8x128xi32>
    %c2 = arith.constant 2 : index
    %14 = memref.load %arg1[%c2] : memref<3xf32, #tpu.memory_space<smem>>
    %15 = vector.broadcast %14 : f32 to vector<8x128xf32>
    %16 = arith.select %13, %15, %11 : vector<8x128xi1>, vector<8x128xf32>
    %c0_2 = arith.constant 0 : index
    %c0_3 = arith.constant 0 : index
    %17 = vector.load %arg3[%c0_2, %c0_3] : memref<8x128xf32, #tpu.memory_space<vmem>>, vector<8x128xf32>
    tpu.vector_store %arg3[%c0_2, %c0_3], %16 {strides = array<i32>} : memref<8x128xf32, #tpu.memory_space<vmem>>, vector<8x128xf32>,
    return
  }
  func.func @transform_0(%arg0: i32) -> i32 {
    %c0_i32 = arith.constant 0 : i32
    %c0_i32_0 = arith.constant 0 : i32
    return %c0_i32 : i32
  }
  func.func @transform_1(%arg0: i32) -> (i32, i32) {
    %c0_i32 = arith.constant 0 : i32
    %c0_i32_0 = arith.constant 0 : i32
    return %c0_i32, %arg0 : i32, i32
  }
  func.func @transform_2(%arg0: i32) -> (i32, i32) {
    %c0_i32 = arith.constant 0 : i32
    %c0_i32_0 = arith.constant 0 : i32
    return %c0_i32, %arg0 : i32, i32
  }
}

</mosaic_0001>

<bundles_post_ra>
// kernel: run.1
= control target key start
LH: loop header
LB: loop body
LE: loop exit
PB: predicated region body
PF: predicated region fallthrough
CT: control target
= control target key end

     0   :  { %7 = vsyncpa [#allocation4], 0  ;;  %s138_s0 = inlined_call_operand.hbm [shape: f32[3], index: 0, kind: input, shape index: {}]   ;;  %s139_s1 = inlined_call_operand.hbm [shape: s32[8,128], index: 1, kind: input, shape index: {}]   ;;  %s140_s2 = inlined_call_operand.vmem [shape: f32[8,128], index: 2, kind: output, shape index: {}]  }
   0x1   :  { %8 = vsyncpa [#allocation3], 0  ;;  %s58_s11 = scalar_lea.hbm %s138_s0, 16 }
   0x2   :  { %p59_p0 = scmp.ne.s32.totalorder %s138_s0, %s58_s11  ;;  %p62_p1 = scmp.lt.u32.totalorder %s58_s11, %s138_s0 }
   0x4   :  { %p64_p2 = pnand %p62_p1, %p59_p0 }
   0x6   :  { %67 = shalt.err (!%p64_p2)
}
   0x7   :  { %s94_s16 = smov [#allocation2]   ;;  %s95_s19 = smov [#allocation5]  }
   0x8   :  { %16 = dma.hbm_to_smem %s138_s0, 16, %s94_s16, [#allocation4]  }
   0x9   :  { %s23_s20 = sshll.u32 %s95_s19, 4  ;;  %s68_s23 = scalar_lea.hbm %s139_s1, 128  ;;  %s24_s20 = int_to_ptr.vmem [resolvable:$true] %s23_s20 }
   0xa   :  { %p69_p3 = scmp.ne.s32.totalorder %s139_s1, %s68_s23  ;;  %p72_p4 = scmp.lt.u32.totalorder %s68_s23, %s139_s1 }
   0xc   :  { %p74_p5 = pnand %p72_p4, %p69_p3 }
   0xe   :  { %77 = shalt.err (!%p74_p5)
}
   0xf   :  { %s78_s28 = scalar_lea.vmem %s24_s20, 128  ;;  %p83_p7 = scmp.lt.s32.totalorder %s24_s20, %s24_s20 }
  0x10   :  { %p79_p6 = scmp.ne.s32.totalorder %s24_s20, %s78_s28  ;;  %p84_p8 = scmp.lt.s32.totalorder %s78_s28, %s78_s28 }
  0x12   :  { %p85_p9 = por %p84_p8, %p83_p7 }
  0x14   :  { %p86_p10 = pnand %p85_p9, %p79_p6 }
  0x16   :  { %89 = shalt.err (!%p86_p10)
}
  0x17   :  { %26 = dma.hbm_to_vmem [thread:$0]  %s139_s1, 128, %s24_s20, [#allocation3]  }
  0x18   :  { %90 = dma.done.wait [#allocation4], 16  }
  0x19   :  { %91 = vsyncadd [#allocation4], 4294967280 }
  0x1a   :  { %92 = dma.done.wait [#allocation3], 128  }
  0x1b   :  { %93 = vsyncadd [#allocation3], 4294967168 }
  0x1c   :  { %33 = sfence }
  0x1d   :  { %s36_s30 = sld [smem:[#allocation2]]  ;;  %s54_s3 = sld [smem:[#allocation2 + $0x1]]  ;;  %v34_v0 = vld [vmem:[#allocation5] sm:$0xff] }
  0x1e   :  { %s55_s4 = sld [smem:[#allocation2 + $0x2]]  ;;  %vm35_vm0 = vcmp.eq.s32.totalorder %v34_v0, 0  ;;  %vm39_vm1 = vcmp.eq.s32.totalorder %v34_v0, 1  ;;  %vm43_vm2 = vcmp.eq.s32.totalorder %v34_v0, 2 }
  0x23   :  { %v37_v1 = vstv %s36_s30  ;;  %v41_v2 = vstv %s54_s3 }
  0x24   :  { %v38_v3 = vsel %vm35_vm0, %v37_v1, 0.0  ;;  %v45_v4 = vstv %s55_s4 }
  0x25   :  { %v42_v5 = vsel %vm39_vm1, %v41_v2, %v38_v3 }
  0x26   :  { %v46_v6 = vsel %vm43_vm2, %v45_v4, %v42_v5 }
  0x27   :  { %47 = vst [vmem:[%s140_s2] sm:$0xff] %v46_v6 }
  0x28   :  { %52 = vsyncpa [#allocation3], 1 }
  0x29   :  { %53 = vsyncpa [#allocation4], 1 }

</bundles_post_ra>
